<compile_context>
chip_gen: v7x
topology: tpu7x:2x2x1
jax: 0.10.0
libtpu: 0.0.40
codegen_flags: <defaults>
</compile_context>

<pallas_src>
import jax
import jax.numpy as jnp
from jax.experimental import pallas as pl
from jax.experimental.pallas import tpu as pltpu

N = 8     # batch of feature vectors (sublane-aligned)
D = 128   # feature dim (lane-aligned)

_NORM_EPS = 1e-12   # F.normalize default eps (clamps the norm, not norm^2)


def _bb_kernel(t_ref, clear_ref, cor_ref, mid_ref, loss_ref):
    # t lives in SMEM: a single scalar load on the scalar path.
    t = t_ref[0, 0]
    one_m_t = 1.0 - t

    cl = clear_ref[...]
    co = cor_ref[...]
    mi = mid_ref[...]

    n_rows, d = clear_ref.shape

    # F.normalize(x, dim=1): x / max(||x||, eps)  ==  x * rsqrt(max(sumsq, eps^2))
    # (sqrt is monotone, so clamping sumsq at eps^2 preserves exact parity).
    def l2norm(x):
        sumsq = jnp.sum(x * x, axis=1, keepdims=True)
        return x * jax.lax.rsqrt(jnp.maximum(sumsq, _NORM_EPS * _NORM_EPS))

    cl_n = l2norm(cl)
    co_n = l2norm(co)
    mi_n = l2norm(mi)

    # micro(): per-row dot product of the normalized clear / corrupted feats.
    dot = jnp.sum(cl_n * co_n, axis=1, keepdims=True)            # (N, 1)
    numerator = t * co_n + one_m_t * cl_n                        # (N, D)
    # No epsilon in the denominator, matching the reference (can produce
    # inf/NaN when dot ~= -1 and t ~= 0.5).
    inv_den = jax.lax.rsqrt(t * t + one_m_t * one_m_t
                            + 2.0 * t * one_m_t * dot)           # (N, 1)
    micro_feat = numerator * inv_den                             # (N, D)

    # sim_cm1 / sim_cm2 are dead code in the reference forward; omitted.

    # nn.MSELoss over the length-D vector of the LAST row only
    # (earlier rows never contribute to the returned loss).
    diff = mi_n[n_rows - 1:n_rows, :] - micro_feat[n_rows - 1:n_rows, :]
    mse_last = jnp.sum(diff * diff) / jnp.float32(d)

    # loss = (mse_last / N) * 1e6, emitted as a single SMEM scalar.
    loss_ref[0, 0] = (mse_last / jnp.float32(n_rows)) * 1e6


def brownian_bridge_loss(feat_clear, feat_cor, feat_mid, t):
    """feat_* : (N, D) float32, t : python/np/JAX scalar.  Returns scalar loss."""
    n, d = feat_clear.shape
    t_arr = jnp.full((1, 1), t, dtype=jnp.float32)

    loss = pl.pallas_call(
        _bb_kernel,
        out_shape=jax.ShapeDtypeStruct((1, 1), jnp.float32),
        in_specs=[
            pl.BlockSpec(memory_space=pltpu.MemorySpace.SMEM),   # t (scalar)
            pl.BlockSpec(memory_space=pltpu.MemorySpace.VMEM),   # feat_clear
            pl.BlockSpec(memory_space=pltpu.MemorySpace.VMEM),   # feat_cor
            pl.BlockSpec(memory_space=pltpu.MemorySpace.VMEM),   # feat_mid
        ],
        out_specs=pl.BlockSpec(memory_space=pltpu.MemorySpace.SMEM),
        # Whole working set is ~16 KiB: single full-block invocation, no grid.
    )(t_arr, feat_clear, feat_cor, feat_mid)

    return loss[0, 0]


if __name__ == "__main__":
    key = jax.random.PRNGKey(0)
    k1, k2, k3 = jax.random.split(key, 3)
    feat_clear = jax.random.normal(k1, (N, D), dtype=jnp.float32)
    feat_cor = jax.random.normal(k2, (N, D), dtype=jnp.float32)
    feat_mid = jax.random.normal(k3, (N, D), dtype=jnp.float32)
    t = 0.3

    loss = brownian_bridge_loss(feat_clear, feat_cor, feat_mid, t)
    jax.block_until_ready(loss)

    assert loss.shape == ()
    assert bool(jnp.isfinite(loss))
    print("KERNEL_OK")
</pallas_src>

<mosaic_0001>
module attributes {stable_mosaic.version = 11 : i64} {
  func.func @_bb_kernel(%arg0: memref<1x1xf32, #tpu.memory_space<smem>>, %arg1: memref<8x128xf32, #tpu.memory_space<vmem>>, %arg2: memref<8x128xf32, #tpu.memory_space<vmem>>, %arg3: memref<8x128xf32, #tpu.memory_space<vmem>>, %arg4: memref<1x1xf32, #tpu.memory_space<smem>>) attributes {dimension_semantics = [], scalar_prefetch = 0 : i64, scratch_operands = 0 : i64, tpu.core_type = #tpu.core_type<tc>} {
    %c0 = arith.constant 0 : index
    %c0_0 = arith.constant 0 : index
    %0 = memref.load %arg0[%c0, %c0_0] : memref<1x1xf32, #tpu.memory_space<smem>>
    %cst = arith.constant 1.000000e+00 : f32
    %1 = arith.subf %cst, %0 : f32
    %c0_1 = arith.constant 0 : index
    %c0_2 = arith.constant 0 : index
    %2 = vector.load %arg1[%c0_1, %c0_2] : memref<8x128xf32, #tpu.memory_space<vmem>>, vector<8x128xf32>
    %c0_3 = arith.constant 0 : index
    %c0_4 = arith.constant 0 : index
    %3 = vector.load %arg2[%c0_3, %c0_4] : memref<8x128xf32, #tpu.memory_space<vmem>>, vector<8x128xf32>
    %c0_5 = arith.constant 0 : index
    %c0_6 = arith.constant 0 : index
    %4 = vector.load %arg3[%c0_5, %c0_6] : memref<8x128xf32, #tpu.memory_space<vmem>>, vector<8x128xf32>
    %5 = arith.mulf %2, %2 : vector<8x128xf32>
    %cst_7 = arith.constant dense<0.000000e+00> : vector<8xf32>
    %6 = vector.multi_reduction <add>, %5, %cst_7 [1] : vector<8x128xf32> to vector<8xf32>
    %7 = vector.shape_cast %6 : vector<8xf32> to vector<8x1xf32>
    %cst_8 = arith.constant 1.000000e-24 : f32
    %8 = vector.broadcast %cst_8 : f32 to vector<8x1xf32>
    %9 = arith.maximumf %7, %8 : vector<8x1xf32>
    %10 = math.rsqrt %9 : vector<8x1xf32>
    %11 = vector.broadcast %10 : vector<8x1xf32> to vector<8x128xf32>
    %12 = arith.mulf %2, %11 : vector<8x128xf32>
    %13 = arith.mulf %3, %3 : vector<8x128xf32>
    %cst_9 = arith.constant dense<0.000000e+00> : vector<8xf32>
    %14 = vector.multi_reduction <add>, %13, %cst_9 [1] : vector<8x128xf32> to vector<8xf32>
    %15 = vector.shape_cast %14 : vector<8xf32> to vector<8x1xf32>
    %cst_10 = arith.constant 1.000000e-24 : f32
    %16 = vector.broadcast %cst_10 : f32 to vector<8x1xf32>
    %17 = arith.maximumf %15, %16 : vector<8x1xf32>
    %18 = math.rsqrt %17 : vector<8x1xf32>
    %19 = vector.broadcast %18 : vector<8x1xf32> to vector<8x128xf32>
    %20 = arith.mulf %3, %19 : vector<8x128xf32>
    %21 = arith.mulf %4, %4 : vector<8x128xf32>
    %cst_11 = arith.constant dense<0.000000e+00> : vector<8xf32>
    %22 = vector.multi_reduction <add>, %21, %cst_11 [1] : vector<8x128xf32> to vector<8xf32>
    %23 = vector.shape_cast %22 : vector<8xf32> to vector<8x1xf32>
    %cst_12 = arith.constant 1.000000e-24 : f32
    %24 = vector.broadcast %cst_12 : f32 to vector<8x1xf32>
    %25 = arith.maximumf %23, %24 : vector<8x1xf32>
    %26 = math.rsqrt %25 : vector<8x1xf32>
    %27 = vector.broadcast %26 : vector<8x1xf32> to vector<8x128xf32>
    %28 = arith.mulf %4, %27 : vector<8x128xf32>
    %29 = arith.mulf %12, %20 : vector<8x128xf32>
    %cst_13 = arith.constant dense<0.000000e+00> : vector<8xf32>
    %30 = vector.multi_reduction <add>, %29, %cst_13 [1] : vector<8x128xf32> to vector<8xf32>
    %31 = vector.shape_cast %30 : vector<8xf32> to vector<8x1xf32>
    %32 = vector.broadcast %0 : f32 to vector<8x128xf32>
    %33 = arith.mulf %32, %20 : vector<8x128xf32>
    %34 = vector.broadcast %1 : f32 to vector<8x128xf32>
    %35 = arith.mulf %34, %12 : vector<8x128xf32>
    %36 = arith.addf %33, %35 : vector<8x128xf32>
    %37 = arith.mulf %0, %0 : f32
    %38 = arith.mulf %1, %1 : f32
    %39 = arith.addf %37, %38 : f32
    %cst_14 = arith.constant 2.000000e+00 : f32
    %40 = arith.mulf %cst_14, %0 : f32
    %41 = arith.mulf %40, %1 : f32
    %42 = vector.broadcast %41 : f32 to vector<8x1xf32>
    %43 = arith.mulf %42, %31 : vector<8x1xf32>
    %44 = vector.broadcast %39 : f32 to vector<8x1xf32>
    %45 = arith.addf %44, %43 : vector<8x1xf32>
    %46 = math.rsqrt %45 : vector<8x1xf32>
    %47 = vector.broadcast %46 : vector<8x1xf32> to vector<8x128xf32>
    %48 = arith.mulf %36, %47 : vector<8x128xf32>
    %49 = vector.extract_strided_slice %28 {offsets = [7, 0], sizes = [1, 128], strides = [1, 1]} : vector<8x128xf32> to vector<1x128xf32>
    %50 = vector.extract_strided_slice %48 {offsets = [7, 0], sizes = [1, 128], strides = [1, 1]} : vector<8x128xf32> to vector<1x128xf32>
    %51 = arith.subf %49, %50 : vector<1x128xf32>
    %52 = arith.mulf %51, %51 : vector<1x128xf32>
    %53 = vector.shape_cast %52 : vector<1x128xf32> to vector<1x1x128xf32>
    %cst_15 = arith.constant dense<0.000000e+00> : vector<1xf32>
    %54 = vector.multi_reduction <add>, %53, %cst_15 [1, 2] : vector<1x1x128xf32> to vector<1xf32>
    %55 = vector.shape_cast %54 : vector<1xf32> to vector<1x1x1xf32>
    %56 = vector.extract %55[0, 0, 0] : f32 from vector<1x1x1xf32>
    %cst_16 = arith.constant 1.280000e+02 : f32
    %57 = arith.divf %56, %cst_16 : f32
    %cst_17 = arith.constant 8.000000e+00 : f32
    %58 = arith.divf %57, %cst_17 : f32
    %cst_18 = arith.constant 1.000000e+06 : f32
    %59 = arith.mulf %58, %cst_18 : f32
    %c0_19 = arith.constant 0 : index
    %c0_20 = arith.constant 0 : index
    %60 = memref.load %arg4[%c0_19, %c0_20] : memref<1x1xf32, #tpu.memory_space<smem>>
    memref.store %59, %arg4[%c0_19, %c0_20] : memref<1x1xf32, #tpu.memory_space<smem>>
    return
  }
}

</mosaic_0001>

<bundles_post_ra>
// kernel: tpu_custom_call.1
= control target key start
LH: loop header
LB: loop body
LE: loop exit
PB: predicated region body
PF: predicated region fallthrough
CT: control target
= control target key end

     0   :  { %10 = vsyncpa [#allocation4], 0  ;;  %s278_s0 = inlined_call_operand.<no memory space> [shape: f32[1,1], index: 0, kind: input, shape index: {}]   ;;  %s279_s1 = inlined_call_operand.hbm [shape: f32[8,128], index: 1, kind: input, shape index: {}]   ;;  %s280_s2 = inlined_call_operand.hbm [shape: f32[8,128], index: 2, kind: input, shape index: {}]   ;;  %s281_s3 = inlined_call_operand.vmem [shape: f32[8,128], index: 3, kind: input, shape index: {}]   ;;  %s282_s4 = inlined_call_operand.hbm [shape: f32[1,1], index: 4, kind: output, shape index: {}]  }
   0x1   :  { %11 = vsyncpa [#allocation7], 0 }
   0x2   :  { %12 = vsyncpa [#allocation5], 0  ;;  %s198_s15 = smov [#allocation3]   ;;  %s199_s17 = smov [#allocation6]  }
   0x3   :  { %s21_s16 = sshll.u32 %s198_s15, 4  ;;  %s31_s18 = sshll.u32 %s199_s17, 4  ;;  %s22_s16 = int_to_ptr.vmem [resolvable:$true] %s21_s16  ;;  %s32_s18 = int_to_ptr.vmem [resolvable:$true] %s31_s18 }
   0x4   :  { %s138_s21 = scalar_lea.hbm %s279_s1, 128 }
   0x5   :  { %p139_p0 = scmp.ne.s32.totalorder %s279_s1, %s138_s21  ;;  %p142_p1 = scmp.lt.u32.totalorder %s138_s21, %s279_s1 }
   0x7   :  { %p144_p2 = pnand %p142_p1, %p139_p0 }
   0x9   :  { %147 = shalt.err (!%p144_p2)
}
   0xa   :  { %s148_s26 = scalar_lea.vmem %s22_s16, 128  ;;  %p153_p4 = scmp.lt.s32.totalorder %s22_s16, %s22_s16 }
   0xb   :  { %p149_p3 = scmp.ne.s32.totalorder %s22_s16, %s148_s26  ;;  %p154_p5 = scmp.lt.s32.totalorder %s148_s26, %s148_s26 }
   0xd   :  { %p155_p6 = por %p154_p5, %p153_p4 }
   0xf   :  { %p156_p7 = pnand %p155_p6, %p149_p3 }
  0x11   :  { %159 = shalt.err (!%p156_p7)
}
  0x12   :  { %24 = dma.hbm_to_vmem [thread:$0]  %s279_s1, 128, %s22_s16, [#allocation4]  }
  0x13   :  { %s160_s5 = scalar_lea.hbm %s280_s2, 128 }
  0x14   :  { %p161_p8 = scmp.ne.s32.totalorder %s280_s2, %s160_s5  ;;  %p164_p9 = scmp.lt.u32.totalorder %s160_s5, %s280_s2 }
  0x16   :  { %p166_p10 = pnand %p164_p9, %p161_p8 }
  0x18   :  { %169 = shalt.err (!%p166_p10)
}
  0x19   :  { %s170_s10 = scalar_lea.vmem %s32_s18, 128  ;;  %p175_p12 = scmp.lt.s32.totalorder %s32_s18, %s32_s18 }
  0x1a   :  { %p171_p11 = scmp.ne.s32.totalorder %s32_s18, %s170_s10  ;;  %p176_p13 = scmp.lt.s32.totalorder %s170_s10, %s170_s10 }
  0x1c   :  { %p177_p0 = por %p176_p13, %p175_p12 }
  0x1e   :  { %p178_p1 = pnand %p177_p0, %p171_p11 }
  0x20   :  { %181 = shalt.err (!%p178_p1)
}
  0x21   :  { %34 = dma.hbm_to_vmem [thread:$0]  %s280_s2, 128, %s32_s18, [#allocation7]  }
  0x22   :  { %192 = dma.done.wait [#allocation4], 128  }
  0x23   :  { %193 = vsyncadd [#allocation4], 4294967168 }
  0x24   :  { %194 = dma.done.wait [#allocation7], 128  }
  0x25   :  { %195 = vsyncadd [#allocation7], 4294967168  ;;  %v45_v0 = vld [vmem:[#allocation3] sm:$0xff]  ;;  %v46_v1 = vld [vmem:[#allocation6] sm:$0xff]  ;;  %s44_s2 = ssub.f32 1.0, %s278_s0  ;;  %v69_v11 = vstv %s278_s0  ;;  %s77_s20 = smul.f32 2.0, %s278_s0 }
  0x26   :  { %v48_v2 = vmul.f32 %v45_v0, %v45_v0  ;;  %v54_v3 = vmul.f32 %v46_v1, %v46_v1  ;;  %v47_v14 = vld [vmem:[%s281_s3] sm:$0xff]  ;;  %s74_s23 = smul.f32 %s278_s0, %s278_s0  ;;  %vm90_vm0 = vcmask 1040384   ;;  %s182_s5 = scalar_lea.hbm %s282_s4, 16 }
  0x27   :  { %v71_v12 = vstv %s44_s2  ;;  %v60_v19 = vmul.f32 %v47_v14, %v47_v14  ;;  %s75_s24 = smul.f32 %s44_s2, %s44_s2  ;;  %p183_p2 = scmp.ne.s32.totalorder %s282_s4, %s182_s5 }
  0x28   :  { %49 = vadd.xlane.f32.xlu0 %v48_v2  ;;  %s78_s25 = smul.f32 %s77_s20, %s44_s2  ;;  %p186_p3 = scmp.lt.u32.totalorder %s182_s5, %s282_s4 }
  0x29   :  { %s76_s26 = sadd.f32 %s75_s24, %s74_s23 }
  0x2a   :  { %v79_v20 = vstv %s78_s25  ;;  %p188_p4 = pnand %p186_p3, %p183_p2 }
  0x2b   :  { %v81_v21 = vstv %s76_s26 }
  0x2c   :  { %55 = vadd.xlane.f32.xlu0 %v54_v3 }
  0xb5   :  { %v50_v4 = vpop.xlane.xlu0 %49 }
  0xb6   :  { %v51_v5 = vmax.f32 %v50_v4, 1e-24 }
  0xb8   :  { %130 = vrsqrt.f32 %v51_v5 }
  0xb9   :  { %v56_v6 = vpop.xlane.xlu0 %55 }
  0xba   :  { %v57_v7 = vmax.f32 %v56_v6, 1e-24 }
  0xbc   :  { %132 = vrsqrt.f32 %v57_v7 }
  0xc2   :  { %v131_v8 = vpop.eup %130 }
  0xc3   :  { %v53_v9 = vmul.f32 %v131_v8, %v45_v0 }
  0xc5   :  { %v72_v17 = vmul.f32 %v71_v12, %v53_v9 }
  0xc6   :  { %v133_v10 = vpop.eup %132 }
  0xc7   :  { %v59_v13 = vmul.f32 %v133_v10, %v46_v1 }
  0xc9   :  { %v66_v15 = vmul.f32 %v59_v13, %v53_v9  ;;  %v70_v16 = vmul.f32 %v69_v11, %v59_v13 }
  0xcb   :  { %v73_v18 = vadd.f32 %v72_v17, %v70_v16  ;;  %67 = vadd.xlane.f32.xlu1 %v66_v15 }
  0xcf   :  { %61 = vadd.xlane.f32.xlu1 %v60_v19 }
 0x158   :  { %v68_v22 = vpop.xlane.xlu1 %67 }
 0x159   :  { %v80_v23 = vmul.f32 %v79_v20, %v68_v22 }
 0x15b   :  { %v82_v24 = vadd.f32 %v81_v21, %v80_v23 }
 0x15c   :  { %v62_v25 = vpop.xlane.xlu1 %61 }
 0x15d   :  { %134 = vrsqrt.f32 %v82_v24  ;;  %v63_v26 = vmax.f32 %v62_v25, 1e-24 }
 0x15f   :  { %136 = vrsqrt.f32 %v63_v26 }
 0x167   :  { %v135_v27 = vpop.eup %134 }
 0x168   :  { %v84_v30 = vmul.f32 %v135_v27, %v73_v18 }
 0x169   :  { %v137_v28 = vpop.eup %136 }
 0x16a   :  { %v65_v29 = vmul.f32 %v137_v28, %v47_v14 }
 0x16c   :  { %v85_v31 = vsub.f32 %v65_v29, %v84_v30 }
 0x16e   :  { %v86_v32 = vmul.f32 %v85_v31, %v85_v31 }
 0x170   :  { %v88_v33 = vrot.slane %v86_v32, 7 }
 0x172   :  { %v91_v34 = vsel %vm90_vm0, %v88_v33, 0.0 }
 0x173   :  { %92 = vadd.xlane.f32.xlu0 %v91_v34 }
 0x200   :  { %v93_v35 = vpop.xlane.xlu0 %92 }
 0x201   :  { %v94_v36 = vrot.slane %v93_v35, 4 }
 0x203   :  { %v95_v37 = vadd.f32 %v94_v36, %v93_v35 }
 0x205   :  { %v96_v38 = vrot.slane %v95_v37, 2 }
 0x207   :  { %v97_v39 = vadd.f32 %v96_v38, %v95_v37 }
 0x209   :  { %v98_v40 = vrot.slane %v97_v39, 1 }
 0x20b   :  { %v99_v41 = vadd.f32 %v98_v40, %v97_v39 }
 0x20d   :  { %125 = vpush %v99_v41 }
 0x23e   :  { %s126_s0 = spop %125 }
 0x23f   :  { %s103_s3 = smul.f32 0.0078125, %s126_s0 }
 0x241   :  { %s106_s27 = smul.f32 0.125, %s103_s3 }
 0x243   :  { %s107_s28 = smul.f32 1000000.0, %s106_s27 }
 0x245   :  { %109 = sst [smem:[#allocation8]] %s107_s28 }
 0x246   :  { %191 = shalt.err (!%p188_p4)
}
 0x247   :  { %s200_s10 = smov [#allocation8]  }
 0x248   :  { %117 = dma.smem_to_hbm %s200_s10, 16, %s282_s4, [#allocation5]  }
 0x249   :  { %196 = dma.done.wait [#allocation5], 16  }
 0x24a   :  { %197 = vsyncadd [#allocation5], 4294967280 }
 0x24b   :  { %121 = sfence }
 0x24c   :  { %122 = vsyncpa [#allocation4], 1 }
 0x24d   :  { %123 = vsyncpa [#allocation7], 1 }
 0x24e   :  { %124 = vsyncpa [#allocation5], 1 }

</bundles_post_ra>
